<compile_context>
chip_gen: v7x
topology: tpu7x:2x2x1
jax: 0.10.0
libtpu: 0.0.40
codegen_flags: <defaults>
</compile_context>

<pallas_src>
import jax
import jax.numpy as jnp
from jax.experimental import pallas as pl
from jax.experimental.pallas import tpu as pltpu

_LANE = 128          # lane width; feature dims padded to a multiple of this
_SUBLANE_BF16 = 16   # sublane granularity for bf16-packed batch tiles


def _round_up(x, m):
    return (x + m - 1) // m * m


def _mlp_kernel(x_ref, w1_ref, b1_ref, w2_ref, b2_ref, o_ref):
    # Layer 1: bf16 MXU matmul, f32 accumulation, f32 bias add.
    h = jnp.dot(x_ref[...], w1_ref[...], preferred_element_type=jnp.float32)
    h = h + b1_ref[...]                        # (1, Hp) broadcasts over rows
    # Layer 2: re-pack activations to bf16 for the MXU, keep f32 accumulation.
    out = jnp.dot(h.astype(jnp.bfloat16), w2_ref[...],
                  preferred_element_type=jnp.float32)
    out = out + b2_ref[...]
    # Epilogue in f32; exp lowers to the EUP slot (free under MXU-bound work).
    o_ref[...] = jax.nn.sigmoid(out).astype(o_ref.dtype)


def _build_call(B, Dp, Hp, Op, tile_b, out_dtype, vmem_bytes, single_buffer_consts):
    def const_spec(shape):
        # Weights/biases never change block index; single-buffer them when the
        # Pallas version supports pipeline_mode on pallas_call BlockSpecs.
        if single_buffer_consts:
            return pl.BlockSpec(shape, lambda i: (0,) * len(shape),
                                pipeline_mode=pl.Buffered(1))
        return pl.BlockSpec(shape, lambda i: (0,) * len(shape))

    return pl.pallas_call(
        _mlp_kernel,
        out_shape=jax.ShapeDtypeStruct((B, Op), out_dtype),
        grid_spec=pltpu.PrefetchScalarGridSpec(
            num_scalar_prefetch=0,
            grid=(pl.cdiv(B, tile_b),),
            in_specs=[
                pl.BlockSpec((tile_b, Dp), lambda i: (i, 0)),   # x tile (bf16)
                const_spec((Dp, Hp)),                           # W1 (bf16, resident)
                const_spec((1, Hp)),                            # b1 (f32)
                const_spec((Hp, Op)),                           # W2 (bf16, resident)
                const_spec((1, Op)),                            # b2 (f32)
            ],
            out_specs=pl.BlockSpec((tile_b, Op), lambda i: (i, 0)),
        ),
        compiler_params=pltpu.CompilerParams(
            dimension_semantics=("parallel",),
            vmem_limit_bytes=int(vmem_bytes),
        ),
    )


def mlp_forward(x, w1, b1, w2, b2, *, tile_b=512, lane_align=_LANE):
    """x: (B, D_in); w1: (D_in, H); b1: (H,); w2: (H, D_out); b2: (D_out,).

    Weights are stored (in, out), i.e. pre-transposed relative to nn.Linear's
    (out, in) weight, so the kernel computes x @ W directly.
    Use lane_align=256 on v6e/v7x for large models to match the 256x256 MXU.
    """
    B, D_in = x.shape
    H = w1.shape[1]
    D_out = w2.shape[1]
    out_dtype = x.dtype

    # Lane-dense padding of every feature dim (an output last-dim < 128 would
    # otherwise lower to masked vst.msk partial stores).
    Dp = _round_up(D_in, lane_align)
    Hp = _round_up(H, lane_align)
    Op = _round_up(D_out, lane_align)

    # bf16 MXU operands (accumulation is f32 inside the kernel); biases f32.
    xp = jnp.zeros((B, Dp), jnp.bfloat16).at[:, :D_in].set(x.astype(jnp.bfloat16))
    w1p = jnp.zeros((Dp, Hp), jnp.bfloat16).at[:D_in, :H].set(w1.astype(jnp.bfloat16))
    w2p = jnp.zeros((Hp, Op), jnp.bfloat16).at[:H, :D_out].set(w2.astype(jnp.bfloat16))
    b1p = jnp.zeros((1, Hp), jnp.float32).at[0, :H].set(b1.astype(jnp.float32))
    b2p = jnp.zeros((1, Op), jnp.float32).at[0, :D_out].set(b2.astype(jnp.float32))

    # Batch tile: large to amortize per-step overhead, but keep >= 2 grid
    # programs when B allows so both v7x TensorCores get work; 16-row aligned
    # for bf16 sublane packing. Partial last blocks are handled by Pallas
    # (padded rows are computed but never written back -- harmless).
    if B <= _SUBLANE_BF16:
        tile_b = B
    else:
        tile_b = max(_SUBLANE_BF16,
                     min(tile_b, _round_up(pl.cdiv(B, 2), _SUBLANE_BF16)))

    # Explicit VMEM budget (upper bound assumes double-buffered consts so the
    # no-Buffered(1) fallback still fits); clamp to v7x's 64 MiB physical VMEM.
    out_isz = jnp.dtype(out_dtype).itemsize
    weight_bytes = (Dp * Hp + Hp * Op) * 2 + (Hp + Op) * 4
    io_bytes = 2 * (tile_b * Dp * 2 + tile_b * Op * out_isz)   # double-buffered tiles
    live_bytes = tile_b * Hp * 4 + tile_b * Op * 4             # f32 intermediates
    vmem_bytes = min(max(2 * weight_bytes + io_bytes + live_bytes + (2 << 20),
                         16 << 20), 64 << 20)

    args = (xp, w1p, b1p, w2p, b2p)
    try:
        out_padded = _build_call(B, Dp, Hp, Op, tile_b, out_dtype, vmem_bytes,
                                 single_buffer_consts=True)(*args)
    except Exception:
        # Some Pallas versions reject pl.Buffered(1) on pallas_call BlockSpecs;
        # default double-buffering is still correct (just 2x weight VMEM).
        out_padded = _build_call(B, Dp, Hp, Op, tile_b, out_dtype, vmem_bytes,
                                 single_buffer_consts=False)(*args)
    return out_padded[:, :D_out]


def init_params(key, input_dim, hidden_dim, output_dim):
    """Mimics nn.Linear's uniform(-1/sqrt(fan_in), 1/sqrt(fan_in)) init."""
    k1, k2, k3, k4 = jax.random.split(key, 4)
    bound1 = 1.0 / (input_dim ** 0.5)
    bound2 = 1.0 / (hidden_dim ** 0.5)
    w1 = jax.random.uniform(k1, (input_dim, hidden_dim), jnp.float32, -bound1, bound1)
    b1 = jax.random.uniform(k2, (hidden_dim,), jnp.float32, -bound1, bound1)
    w2 = jax.random.uniform(k3, (hidden_dim, output_dim), jnp.float32, -bound2, bound2)
    b2 = jax.random.uniform(k4, (output_dim,), jnp.float32, -bound2, bound2)
    return w1, b1, w2, b2


if __name__ == "__main__":
    key = jax.random.PRNGKey(0)
    kx, kp = jax.random.split(key)

    # Small shapes consistent with MLPModel(input_dim, hidden_dim, output_dim).
    batch, input_dim, hidden_dim, output_dim = 8, 32, 64, 16

    x = jax.random.normal(kx, (batch, input_dim), jnp.float32)
    w1, b1, w2, b2 = init_params(kp, input_dim, hidden_dim, output_dim)

    out = jax.block_until_ready(mlp_forward(x, w1, b1, w2, b2))
    assert out.shape == (batch, output_dim)

    # Reference mirroring the kernel numerics (bf16 MXU operands, f32 accum).
    xb, w1b, w2b = (a.astype(jnp.bfloat16) for a in (x, w1, w2))
    h_ref = jnp.dot(xb, w1b, preferred_element_type=jnp.float32) + b1
    ref = jax.nn.sigmoid(jnp.dot(h_ref.astype(jnp.bfloat16), w2b,
                                 preferred_element_type=jnp.float32) + b2)
    assert jnp.allclose(out, ref, atol=1e-2, rtol=1e-2), \
        float(jnp.max(jnp.abs(out - ref)))

    # Looser sanity check vs. the pure-f32 PyTorch semantics (bf16 matmul error).
    ref_f32 = jax.nn.sigmoid((x @ w1 + b1) @ w2 + b2)
    assert jnp.allclose(out, ref_f32, atol=5e-2, rtol=5e-2)

    print("KERNEL_OK")
</pallas_src>

<mosaic_0001>
module attributes {stable_mosaic.version = 11 : i64} {
  func.func @_mlp_kernel(%arg0: i32, %arg1: memref<8x128xbf16, #tpu.memory_space<vmem>>, %arg2: memref<128x128xbf16, #tpu.memory_space<vmem>>, %arg3: memref<1x128xf32, #tpu.memory_space<vmem>>, %arg4: memref<128x128xbf16, #tpu.memory_space<vmem>>, %arg5: memref<1x128xf32, #tpu.memory_space<vmem>>, %arg6: memref<8x128xf32, #tpu.memory_space<vmem>>) attributes {dimension_semantics = [#tpu.dimension_semantics<parallel>], iteration_bounds = array<i64: 1>, scalar_prefetch = 0 : i64, scratch_operands = 0 : i64, tpu.core_type = #tpu.core_type<tc>, window_params = [{transform_indices = @transform_0, window_bounds = array<i64: 8, 128>}, {pipeline_mode = #tpu.pipeline_mode<synchronous>, transform_indices = @transform_1, window_bounds = array<i64: 128, 128>}, {pipeline_mode = #tpu.pipeline_mode<synchronous>, transform_indices = @transform_2, window_bounds = array<i64: 1, 128>}, {pipeline_mode = #tpu.pipeline_mode<synchronous>, transform_indices = @transform_3, window_bounds = array<i64: 128, 128>}, {pipeline_mode = #tpu.pipeline_mode<synchronous>, transform_indices = @transform_4, window_bounds = array<i64: 1, 128>}, {transform_indices = @transform_5, window_bounds = array<i64: 8, 128>}]} {
    %c0 = arith.constant 0 : index
    %c0_0 = arith.constant 0 : index
    %0 = vector.load %arg1[%c0, %c0_0] : memref<8x128xbf16, #tpu.memory_space<vmem>>, vector<8x128xbf16>
    %c0_1 = arith.constant 0 : index
    %c0_2 = arith.constant 0 : index
    %1 = vector.load %arg2[%c0_1, %c0_2] : memref<128x128xbf16, #tpu.memory_space<vmem>>, vector<128x128xbf16>
    %cst = arith.constant dense<0.000000e+00> : vector<8x128xf32>
    %2 = tpu.matmul %0, %1, %cst {dimension_numbers = #tpu.dot_dimension_numbers<[1], [0], [0], [1], [0, 0, 1, 1], [], []>} : vector<8x128xbf16>, vector<128x128xbf16>, vector<8x128xf32> -> vector<8x128xf32>
    %c0_3 = arith.constant 0 : index
    %c0_4 = arith.constant 0 : index
    %3 = vector.load %arg3[%c0_3, %c0_4] : memref<1x128xf32, #tpu.memory_space<vmem>>, vector<1x128xf32>
    %4 = vector.broadcast %3 : vector<1x128xf32> to vector<8x128xf32>
    %5 = arith.addf %2, %4 : vector<8x128xf32>
    %6 = arith.truncf %5 : vector<8x128xf32> to vector<8x128xbf16>
    %c0_5 = arith.constant 0 : index
    %c0_6 = arith.constant 0 : index
    %7 = vector.load %arg4[%c0_5, %c0_6] : memref<128x128xbf16, #tpu.memory_space<vmem>>, vector<128x128xbf16>
    %cst_7 = arith.constant dense<0.000000e+00> : vector<8x128xf32>
    %8 = tpu.matmul %6, %7, %cst_7 {dimension_numbers = #tpu.dot_dimension_numbers<[1], [0], [0], [1], [0, 0, 1, 1], [], []>} : vector<8x128xbf16>, vector<128x128xbf16>, vector<8x128xf32> -> vector<8x128xf32>
    %c0_8 = arith.constant 0 : index
    %c0_9 = arith.constant 0 : index
    %9 = vector.load %arg5[%c0_8, %c0_9] : memref<1x128xf32, #tpu.memory_space<vmem>>, vector<1x128xf32>
    %10 = vector.broadcast %9 : vector<1x128xf32> to vector<8x128xf32>
    %11 = arith.addf %8, %10 : vector<8x128xf32>
    %12 = arith.negf %11 : vector<8x128xf32>
    %13 = math.exp %12 : vector<8x128xf32>
    %cst_10 = arith.constant 1.000000e+00 : f32
    %14 = vector.broadcast %cst_10 : f32 to vector<8x128xf32>
    %15 = arith.addf %14, %13 : vector<8x128xf32>
    %16 = arith.divf %14, %15 : vector<8x128xf32>
    %c0_11 = arith.constant 0 : index
    %c0_12 = arith.constant 0 : index
    %17 = vector.load %arg6[%c0_11, %c0_12] : memref<8x128xf32, #tpu.memory_space<vmem>>, vector<8x128xf32>
    tpu.vector_store %arg6[%c0_11, %c0_12], %16 {strides = array<i32>} : memref<8x128xf32, #tpu.memory_space<vmem>>, vector<8x128xf32>,
    return
  }
  func.func @transform_0(%arg0: i32) -> (i32, i32) {
    %c0_i32 = arith.constant 0 : i32
    %c0_i32_0 = arith.constant 0 : i32
    return %arg0, %c0_i32 : i32, i32
  }
  func.func @transform_1(%arg0: i32) -> (i32, i32) {
    %c0_i32 = arith.constant 0 : i32
    %c0_i32_0 = arith.constant 0 : i32
    %c0_i32_1 = arith.constant 0 : i32
    return %c0_i32, %c0_i32_0 : i32, i32
  }
  func.func @transform_2(%arg0: i32) -> (i32, i32) {
    %c0_i32 = arith.constant 0 : i32
    %c0_i32_0 = arith.constant 0 : i32
    %c0_i32_1 = arith.constant 0 : i32
    return %c0_i32, %c0_i32_0 : i32, i32
  }
  func.func @transform_3(%arg0: i32) -> (i32, i32) {
    %c0_i32 = arith.constant 0 : i32
    %c0_i32_0 = arith.constant 0 : i32
    %c0_i32_1 = arith.constant 0 : i32
    return %c0_i32, %c0_i32_0 : i32, i32
  }
  func.func @transform_4(%arg0: i32) -> (i32, i32) {
    %c0_i32 = arith.constant 0 : i32
    %c0_i32_0 = arith.constant 0 : i32
    %c0_i32_1 = arith.constant 0 : i32
    return %c0_i32, %c0_i32_0 : i32, i32
  }
  func.func @transform_5(%arg0: i32) -> (i32, i32) {
    %c0_i32 = arith.constant 0 : i32
    %c0_i32_0 = arith.constant 0 : i32
    return %arg0, %c0_i32 : i32, i32
  }
}

module attributes {stable_mosaic.version = 11 : i64} {
  func.func @_mlp_kernel(%arg0: i32, %arg1: memref<8x128xbf16, #tpu.memory_space<vmem>>, %arg2: memref<128x128xbf16, #tpu.memory_space<vmem>>, %arg3: memref<1x128xf32, #tpu.memory_space<vmem>>, %arg4: memref<128x128xbf16, #tpu.memory_space<vmem>>, %arg5: memref<1x128xf32, #tpu.memory_space<vmem>>, %arg6: memref<8x128xf32, #tpu.memory_space<vmem>>) attributes {dimension_semantics = [#tpu.dimension_semantics<parallel>], iteration_bounds = array<i64: 1>, scalar_prefetch = 0 : i64, scratch_operands = 0 : i64, tpu.core_type = #tpu.core_type<tc>, window_params = [{transform_indices = @transform_0, window_bounds = array<i64: 8, 128>}, {pipeline_mode = #tpu.pipeline_mode<synchronous>, transform_indices = @transform_1, window_bounds = array<i64: 128, 128>}, {pipeline_mode = #tpu.pipeline_mode<synchronous>, transform_indices = @transform_2, window_bounds = array<i64: 1, 128>}, {pipeline_mode = #tpu.pipeline_mode<synchronous>, transform_indices = @transform_3, window_bounds = array<i64: 128, 128>}, {pipeline_mode = #tpu.pipeline_mode<synchronous>, transform_indices = @transform_4, window_bounds = array<i64: 1, 128>}, {transform_indices = @transform_5, window_bounds = array<i64: 8, 128>}]} {
    %c0 = arith.constant 0 : index
    %c0_0 = arith.constant 0 : index
    %0 = vector.load %arg1[%c0, %c0_0] : memref<8x128xbf16, #tpu.memory_space<vmem>>, vector<8x128xbf16>
    %c0_1 = arith.constant 0 : index
    %c0_2 = arith.constant 0 : index
    %1 = vector.load %arg2[%c0_1, %c0_2] : memref<128x128xbf16, #tpu.memory_space<vmem>>, vector<128x128xbf16>
    %cst = arith.constant dense<0.000000e+00> : vector<8x128xf32>
    %2 = tpu.matmul %0, %1, %cst {dimension_numbers = #tpu.dot_dimension_numbers<[1], [0], [0], [1], [0, 0, 1, 1], [], []>} : vector<8x128xbf16>, vector<128x128xbf16>, vector<8x128xf32> -> vector<8x128xf32>
    %c0_3 = arith.constant 0 : index
    %c0_4 = arith.constant 0 : index
    %3 = vector.load %arg3[%c0_3, %c0_4] : memref<1x128xf32, #tpu.memory_space<vmem>>, vector<1x128xf32>
    %4 = vector.broadcast %3 : vector<1x128xf32> to vector<8x128xf32>
    %5 = arith.addf %2, %4 : vector<8x128xf32>
    %6 = arith.truncf %5 : vector<8x128xf32> to vector<8x128xbf16>
    %c0_5 = arith.constant 0 : index
    %c0_6 = arith.constant 0 : index
    %7 = vector.load %arg4[%c0_5, %c0_6] : memref<128x128xbf16, #tpu.memory_space<vmem>>, vector<128x128xbf16>
    %cst_7 = arith.constant dense<0.000000e+00> : vector<8x128xf32>
    %8 = tpu.matmul %6, %7, %cst_7 {dimension_numbers = #tpu.dot_dimension_numbers<[1], [0], [0], [1], [0, 0, 1, 1], [], []>} : vector<8x128xbf16>, vector<128x128xbf16>, vector<8x128xf32> -> vector<8x128xf32>
    %c0_8 = arith.constant 0 : index
    %c0_9 = arith.constant 0 : index
    %9 = vector.load %arg5[%c0_8, %c0_9] : memref<1x128xf32, #tpu.memory_space<vmem>>, vector<1x128xf32>
    %10 = vector.broadcast %9 : vector<1x128xf32> to vector<8x128xf32>
    %11 = arith.addf %8, %10 : vector<8x128xf32>
    %12 = arith.negf %11 : vector<8x128xf32>
    %13 = math.exp %12 : vector<8x128xf32>
    %cst_10 = arith.constant 1.000000e+00 : f32
    %14 = vector.broadcast %cst_10 : f32 to vector<8x128xf32>
    %15 = arith.addf %14, %13 : vector<8x128xf32>
    %16 = arith.divf %14, %15 : vector<8x128xf32>
    %c0_11 = arith.constant 0 : index
    %c0_12 = arith.constant 0 : index
    %17 = vector.load %arg6[%c0_11, %c0_12] : memref<8x128xf32, #tpu.memory_space<vmem>>, vector<8x128xf32>
    tpu.vector_store %arg6[%c0_11, %c0_12], %16 {strides = array<i32>} : memref<8x128xf32, #tpu.memory_space<vmem>>, vector<8x128xf32>,
    return
  }
  func.func @transform_0(%arg0: i32) -> (i32, i32) {
    %c0_i32 = arith.constant 0 : i32
    %c0_i32_0 = arith.constant 0 : i32
    return %arg0, %c0_i32 : i32, i32
  }
  func.func @transform_1(%arg0: i32) -> (i32, i32) {
    %c0_i32 = arith.constant 0 : i32
    %c0_i32_0 = arith.constant 0 : i32
    %c0_i32_1 = arith.constant 0 : i32
    return %c0_i32, %c0_i32_0 : i32, i32
  }
  func.func @transform_2(%arg0: i32) -> (i32, i32) {
    %c0_i32 = arith.constant 0 : i32
    %c0_i32_0 = arith.constant 0 : i32
    %c0_i32_1 = arith.constant 0 : i32
    return %c0_i32, %c0_i32_0 : i32, i32
  }
  func.func @transform_3(%arg0: i32) -> (i32, i32) {
    %c0_i32 = arith.constant 0 : i32
    %c0_i32_0 = arith.constant 0 : i32
    %c0_i32_1 = arith.constant 0 : i32
    return %c0_i32, %c0_i32_0 : i32, i32
  }
  func.func @transform_4(%arg0: i32) -> (i32, i32) {
    %c0_i32 = arith.constant 0 : i32
    %c0_i32_0 = arith.constant 0 : i32
    %c0_i32_1 = arith.constant 0 : i32
    return %c0_i32, %c0_i32_0 : i32, i32
  }
  func.func @transform_5(%arg0: i32) -> (i32, i32) {
    %c0_i32 = arith.constant 0 : i32
    %c0_i32_0 = arith.constant 0 : i32
    return %arg0, %c0_i32 : i32, i32
  }
}

</mosaic_0001>

<bundles_post_ra>
// kernel: tpu_custom_call.1
= control target key start
LH: loop header
LB: loop body
LE: loop exit
PB: predicated region body
PF: predicated region fallthrough
CT: control target
= control target key end

     0   :  { %10 = vsyncpa [#allocation3], 0  ;;  %s605_s0 = inlined_call_operand.hbm [shape: bf16[8,128], index: 0, kind: input, shape index: {}]   ;;  %s606_s1 = inlined_call_operand.hbm [shape: bf16[128,128], index: 1, kind: input, shape index: {}]   ;;  %s607_s2 = inlined_call_operand.vmem [shape: f32[1,128], index: 2, kind: input, shape index: {}]   ;;  %s608_s3 = inlined_call_operand.hbm [shape: bf16[128,128], index: 3, kind: input, shape index: {}]   ;;  %s609_s4 = inlined_call_operand.vmem [shape: f32[1,128], index: 4, kind: input, shape index: {}]   ;;  %s610_s5 = inlined_call_operand.hbm [shape: f32[8,128], index: 5, kind: output, shape index: {}]  }
   0x1   :  { %11 = vsyncpa [#allocation6], 0 }
   0x2   :  { %12 = vsyncpa [#allocation4], 0  ;;  %s507_s18 = smov [#allocation5]   ;;  %s413_s22 = scalar_lea.hbm %s606_s1, 1024 }
   0x3   :  { %s28_s19 = sshll.u32 %s507_s18, 4  ;;  %p414_p0 = scmp.ne.s32.totalorder %s606_s1, %s413_s22  ;;  %s29_s19 = int_to_ptr.vmem [resolvable:$true] %s28_s19 }
   0x4   :  { %p417_p1 = scmp.lt.u32.totalorder %s413_s22, %s606_s1 }
   0x6   :  { %p419_p2 = pnand %p417_p1, %p414_p0 }
   0x8   :  { %422 = shalt.err (!%p419_p2)
}
   0x9   :  { %s423_s27 = scalar_lea.vmem %s29_s19, 1024  ;;  %p428_p4 = scmp.lt.s32.totalorder %s29_s19, %s29_s19 }
   0xa   :  { %p424_p3 = scmp.ne.s32.totalorder %s29_s19, %s423_s27  ;;  %p429_p5 = scmp.lt.s32.totalorder %s423_s27, %s423_s27 }
   0xc   :  { %p430_p6 = por %p429_p5, %p428_p4 }
   0xe   :  { %p431_p7 = pnand %p430_p6, %p424_p3 }
  0x10   :  { %434 = shalt.err (!%p431_p7)
}
  0x11   :  { %s508_s28 = smov 64   ;;  %s509_s29 = smov 4  }
  0x12   :  { %34 = dma.hbm_to_vmem [thread:$0]  %s606_s1, 1024, %s29_s19, [#allocation6], %s508_s28, %s508_s28, %s509_s29  }
  0x13   :  { %s510_s7 = smov [#allocation2]   ;;  %s511_s9 = smov [#allocation7]  }
  0x14   :  { %s19_s8 = sshll.u32 %s510_s7, 4  ;;  %s42_s10 = sshll.u32 %s511_s9, 4  ;;  %s20_s8 = int_to_ptr.vmem [resolvable:$true] %s19_s8  ;;  %s43_s10 = int_to_ptr.vmem [resolvable:$true] %s42_s10 }
  0x15   :  { %s435_s13 = scalar_lea.hbm %s605_s0, 64 }
  0x16   :  { %p436_p8 = scmp.ne.s32.totalorder %s605_s0, %s435_s13  ;;  %p439_p9 = scmp.lt.u32.totalorder %s435_s13, %s605_s0 }
  0x18   :  { %p441_p10 = pnand %p439_p9, %p436_p8 }
  0x1a   :  { %444 = shalt.err (!%p441_p10)
}
  0x1b   :  { %s445_s1 = scalar_lea.vmem %s20_s8, 64  ;;  %p450_p12 = scmp.lt.s32.totalorder %s20_s8, %s20_s8 }
  0x1c   :  { %p446_p11 = scmp.ne.s32.totalorder %s20_s8, %s445_s1  ;;  %p451_p13 = scmp.lt.s32.totalorder %s445_s1, %s445_s1 }
  0x1e   :  { %p452_p0 = por %p451_p13, %p450_p12 }
  0x20   :  { %p453_p1 = pnand %p452_p0, %p446_p11 }
  0x22   :  { %456 = shalt.err (!%p453_p1)
}
  0x23   :  { %22 = dma.hbm_to_vmem [thread:$0]  %s605_s0, 64, %s20_s8, [#allocation3]  }
  0x24   :  { %s457_s22 = scalar_lea.hbm %s608_s3, 1024 }
  0x25   :  { %p458_p2 = scmp.ne.s32.totalorder %s608_s3, %s457_s22  ;;  %p461_p3 = scmp.lt.u32.totalorder %s457_s22, %s608_s3 }
  0x27   :  { %p463_p4 = pnand %p461_p3, %p458_p2 }
  0x29   :  { %466 = shalt.err (!%p463_p4)
}
  0x2a   :  { %s467_s27 = scalar_lea.vmem %s43_s10, 1024  ;;  %p472_p6 = scmp.lt.s32.totalorder %s43_s10, %s43_s10 }
  0x2b   :  { %p468_p5 = scmp.ne.s32.totalorder %s43_s10, %s467_s27  ;;  %p473_p7 = scmp.lt.s32.totalorder %s467_s27, %s467_s27 }
  0x2d   :  { %p474_p8 = por %p473_p7, %p472_p6 }
  0x2f   :  { %p475_p9 = pnand %p474_p8, %p468_p5 }
  0x31   :  { %478 = shalt.err (!%p475_p9)
}
  0x32   :  { %48 = dma.hbm_to_vmem [thread:$0]  %s608_s3, 1024, %s43_s10, [#allocation6], %s508_s28, %s508_s28, %s509_s29  }
  0x33   :  { %501 = dma.done.wait [#allocation3], 64  }
  0x34   :  { %502 = vsyncadd [#allocation3], 4294967232 }
  0x35   :  { %503 = dma.done.wait [#allocation6], 2048  }
  0x36   :  { %504 = vsyncadd [#allocation6], 4294965248  ;;  %v512_v0 = vmov 0.0   ;;  %vm513_vm0 = vmmov 0   ;;  %v393_v1 = vld [vmem:[#allocation5] sm:$0xff]   ;;  %v394_v2 = vld [vmem:[#allocation5 + $0x8] sm:$0xff]  }
  0x37   :  { %345 = vmatprep.subr.bf16.mxu0 %v512_v0  ;;  %361 = vmatprep.mubr.msk.bf16.mxu0 %vm513_vm0, %v512_v0  ;;  %v395_v3 = vld [vmem:[#allocation5 + $0x10] sm:$0xff]   ;;  %v401_v4 = vld [vmem:[#allocation7] sm:$0xff]   ;;  %v396_v5 = vld [vmem:[#allocation5 + $0x18] sm:$0xff]  }
  0x38   :  { %365 = vmatprep.subr.bf16.mxu1 %v512_v0  ;;  %381 = vmatprep.mubr.msk.bf16.mxu1 %vm513_vm0, %v512_v0  ;;  %v402_v6 = vld [vmem:[#allocation7 + $0x8] sm:$0xff]   ;;  %v397_v7 = vld [vmem:[#allocation5 + $0x20] sm:$0xff]   ;;  %v403_v8 = vld [vmem:[#allocation7 + $0x10] sm:$0xff]  }
  0x39   :  { %346 = vmatpush3.bf16.msra.mxu0 %v393_v1  ;;  %366 = vmatpush3.bf16.msra.mxu1 %v401_v4  ;;  %v398_v9 = vld [vmem:[#allocation5 + $0x28] sm:$0xff]   ;;  %v404_v10 = vld [vmem:[#allocation7 + $0x18] sm:$0xff]   ;;  %v399_v11 = vld [vmem:[#allocation5 + $0x30] sm:$0xff]  }
  0x3a   :  { %347 = vmatprep.subr.bf16.mxu0 %v512_v0  ;;  %367 = vmatprep.subr.bf16.mxu1 %v512_v0  ;;  %v405_v12 = vld [vmem:[#allocation7 + $0x20] sm:$0xff]   ;;  %v400_v13 = vld [vmem:[#allocation5 + $0x38] sm:$0xff]   ;;  %v406_v14 = vld [vmem:[#allocation7 + $0x28] sm:$0xff]  }
  0x3b   :  { %v61_v15 = vld [vmem:[#allocation2] sm:$0xf]  ;;  %v407_v16 = vld [vmem:[#allocation7 + $0x30] sm:$0xff]  }
  0x3c   :  { %v408_v17 = vld [vmem:[#allocation7 + $0x38] sm:$0xff]  }
  0x3d   :  { %348 = vmatpush3.bf16.msra.mxu0 %v394_v2  ;;  %368 = vmatpush3.bf16.msra.mxu1 %v402_v6  ;;  %v308_v18 = vld [vmem:[%s607_s2] ss:$0 sm:$0xff]  ;;  %s514_s2 = smov [#allocation8]  }
  0x3e   :  { %349 = vmatprep.subr.bf16.mxu0 %v512_v0  ;;  %369 = vmatprep.subr.bf16.mxu1 %v512_v0  ;;  %v317_v25 = vld [vmem:[%s609_s4] ss:$0 sm:$0xff]  ;;  %s298_s7 = sshll.u32 %s514_s2, 4  ;;  %s299_s7 = int_to_ptr.vmem [resolvable:$true] %s298_s7 }
  0x3f   :  { %s479_s8 = scalar_lea.vmem %s299_s7, 128  ;;  %p484_p11 = scmp.lt.s32.totalorder %s299_s7, %s299_s7 }
  0x40   :  { %p480_p10 = scmp.ne.s32.totalorder %s299_s7, %s479_s8  ;;  %p485_p12 = scmp.lt.s32.totalorder %s479_s8, %s479_s8 }
  0x41   :  { %350 = vmatpush3.bf16.msra.mxu0 %v395_v3  ;;  %370 = vmatpush3.bf16.msra.mxu1 %v403_v8 }
  0x42   :  { %351 = vmatprep.subr.bf16.mxu0 %v512_v0  ;;  %371 = vmatprep.subr.bf16.mxu1 %v512_v0  ;;  %p486_p13 = por %p485_p12, %p484_p11 }
  0x44   :  { %p487_p0 = pnand %p486_p13, %p480_p10 }
  0x45   :  { %352 = vmatpush3.bf16.msra.mxu0 %v396_v5  ;;  %372 = vmatpush3.bf16.msra.mxu1 %v404_v10 }
  0x46   :  { %353 = vmatprep.subr.bf16.mxu0 %v512_v0  ;;  %373 = vmatprep.subr.bf16.mxu1 %v512_v0 }
  0x49   :  { %354 = vmatpush3.bf16.msra.mxu0 %v397_v7  ;;  %374 = vmatpush3.bf16.msra.mxu1 %v405_v12 }
  0x4a   :  { %355 = vmatprep.subr.bf16.mxu0 %v512_v0  ;;  %375 = vmatprep.subr.bf16.mxu1 %v512_v0 }
  0x4d   :  { %356 = vmatpush3.bf16.msra.mxu0 %v398_v9  ;;  %376 = vmatpush3.bf16.msra.mxu1 %v406_v14 }
  0x4e   :  { %357 = vmatprep.subr.bf16.mxu0 %v512_v0  ;;  %377 = vmatprep.subr.bf16.mxu1 %v512_v0 }
  0x51   :  { %358 = vmatpush3.bf16.msra.mxu0 %v399_v11  ;;  %378 = vmatpush3.bf16.msra.mxu1 %v407_v16 }
  0x52   :  { %359 = vmatprep.subr.bf16.mxu0 %v512_v0  ;;  %379 = vmatprep.subr.bf16.mxu1 %v512_v0 }
  0x55   :  { %360 = vmatpush3.bf16.msra.mxu0 %v400_v13  ;;  %380 = vmatpush3.bf16.msra.mxu1 %v408_v17 }
  0x58   :  { %362 = vmatmul.mubr.bf16.vlgmr.msra.gmra.mrb[0].mxu0 %v61_v15 }
 0x12b   :  { %v167_v19 = vpop.f32.mrb[0].mxu0 }
 0x12c   :  { %v168_v20 = vadd.f32 %v308_v18, %v167_v19  ;;  %v363_v21 = vpop.f32.mrb[1].mxu0 }
 0x12d   :  { %v170_v22 = vpop.f32.mrb[2].mxu0 }
 0x12e   :  { %v173_v23 = vpack.c.bf16 %v168_v20, %v168_v20  ;;  %v364_v24 = vpop.f32.mrb[3].mxu0 }
 0x130   :  { %382 = vmatmul.mubr.bf16.vlgmr.msra.gmra.mrb[0].mxu1 %v173_v23 }
 0x203   :  { %v279_v26 = vpop.f32.mrb[0].mxu1 }
 0x204   :  { %v280_v27 = vadd.f32 %v317_v25, %v279_v26  ;;  %v383_v28 = vpop.f32.mrb[1].mxu1 }
 0x205   :  { %v282_v29 = vpop.f32.mrb[2].mxu1 }
 0x206   :  { %v326_v30 = vmul.f32 -1.442695, %v280_v27  ;;  %v384_v31 = vpop.f32.mrb[3].mxu1 }
 0x208   :  { %409 = vpow2.f32 %v326_v30 }
 0x212   :  { %v410_v32 = vpop.eup %409 }
 0x213   :  { %v288_v33 = vadd.f32 1.0, %v410_v32 }
 0x215   :  { %411 = vrcp.f32 %v288_v33 }
 0x21f   :  { %v412_v34 = vpop.eup %411 }
 0x220   :  { %291 = vst [vmem:[#allocation8] sm:$0xff] %v412_v34 }
 0x221   :  { %490 = shalt.err (!%p487_p0)
}
 0x222   :  { %s491_s10 = scalar_lea.hbm %s610_s5, 128 }
 0x223   :  { %p492_p1 = scmp.ne.s32.totalorder %s610_s5, %s491_s10  ;;  %p495_p2 = scmp.lt.u32.totalorder %s491_s10, %s610_s5 }
 0x225   :  { %p497_p3 = pnand %p495_p2, %p492_p1 }
 0x227   :  { %500 = shalt.err (!%p497_p3)
}
 0x228   :  { %301 = dma.vmem_to_hbm [thread:$0]  %s299_s7, 128, %s610_s5, [#allocation4]  }
 0x229   :  { %505 = dma.done.wait [#allocation4], 128  }
 0x22a   :  { %506 = vsyncadd [#allocation4], 4294967168 }
 0x22b   :  { %305 = vsyncpa [#allocation3], 1 }
 0x22c   :  { %306 = vsyncpa [#allocation6], 1 }
 0x22d   :  { %307 = vsyncpa [#allocation4], 1 }

// kernel: tpu_custom_call.1
= control target key start
LH: loop header
LB: loop body
LE: loop exit
PB: predicated region body
PF: predicated region fallthrough
CT: control target
= control target key end

     0   :  { %10 = vsyncpa [#allocation3], 0  ;;  %s605_s0 = inlined_call_operand.hbm [shape: bf16[8,128], index: 0, kind: input, shape index: {}]   ;;  %s606_s1 = inlined_call_operand.hbm [shape: bf16[128,128], index: 1, kind: input, shape index: {}]   ;;  %s607_s2 = inlined_call_operand.vmem [shape: f32[1,128], index: 2, kind: input, shape index: {}]   ;;  %s608_s3 = inlined_call_operand.hbm [shape: bf16[128,128], index: 3, kind: input, shape index: {}]   ;;  %s609_s4 = inlined_call_operand.vmem [shape: f32[1,128], index: 4, kind: input, shape index: {}]   ;;  %s610_s5 = inlined_call_operand.hbm [shape: f32[8,128], index: 5, kind: output, shape index: {}]  }
   0x1   :  { %11 = vsyncpa [#allocation6], 0 }
   0x2   :  { %12 = vsyncpa [#allocation4], 0  ;;  %s507_s18 = smov [#allocation5]   ;;  %s413_s22 = scalar_lea.hbm %s606_s1, 1024 }
   0x3   :  { %s28_s19 = sshll.u32 %s507_s18, 4  ;;  %p414_p0 = scmp.ne.s32.totalorder %s606_s1, %s413_s22  ;;  %s29_s19 = int_to_ptr.vmem [resolvable:$true] %s28_s19 }
   0x4   :  { %p417_p1 = scmp.lt.u32.totalorder %s413_s22, %s606_s1 }
   0x6   :  { %p419_p2 = pnand %p417_p1, %p414_p0 }
   0x8   :  { %422 = shalt.err (!%p419_p2)
}
   0x9   :  { %s423_s27 = scalar_lea.vmem %s29_s19, 1024  ;;  %p428_p4 = scmp.lt.s32.totalorder %s29_s19, %s29_s19 }
   0xa   :  { %p424_p3 = scmp.ne.s32.totalorder %s29_s19, %s423_s27  ;;  %p429_p5 = scmp.lt.s32.totalorder %s423_s27, %s423_s27 }
   0xc   :  { %p430_p6 = por %p429_p5, %p428_p4 }
   0xe   :  { %p431_p7 = pnand %p430_p6, %p424_p3 }
  0x10   :  { %434 = shalt.err (!%p431_p7)
}
  0x11   :  { %s508_s28 = smov 64   ;;  %s509_s29 = smov 4  }
  0x12   :  { %34 = dma.hbm_to_vmem [thread:$0]  %s606_s1, 1024, %s29_s19, [#allocation6], %s508_s28, %s508_s28, %s509_s29  }
  0x13   :  { %s510_s7 = smov [#allocation2]   ;;  %s511_s9 = smov [#allocation7]  }
  0x14   :  { %s19_s8 = sshll.u32 %s510_s7, 4  ;;  %s42_s10 = sshll.u32 %s511_s9, 4  ;;  %s20_s8 = int_to_ptr.vmem [resolvable:$true] %s19_s8  ;;  %s43_s10 = int_to_ptr.vmem [resolvable:$true] %s42_s10 }
  0x15   :  { %s435_s13 = scalar_lea.hbm %s605_s0, 64 }
  0x16   :  { %p436_p8 = scmp.ne.s32.totalorder %s605_s0, %s435_s13  ;;  %p439_p9 = scmp.lt.u32.totalorder %s435_s13, %s605_s0 }
  0x18   :  { %p441_p10 = pnand %p439_p9, %p436_p8 }
  0x1a   :  { %444 = shalt.err (!%p441_p10)
}
  0x1b   :  { %s445_s1 = scalar_lea.vmem %s20_s8, 64  ;;  %p450_p12 = scmp.lt.s32.totalorder %s20_s8, %s20_s8 }
  0x1c   :  { %p446_p11 = scmp.ne.s32.totalorder %s20_s8, %s445_s1  ;;  %p451_p13 = scmp.lt.s32.totalorder %s445_s1, %s445_s1 }
  0x1e   :  { %p452_p0 = por %p451_p13, %p450_p12 }
  0x20   :  { %p453_p1 = pnand %p452_p0, %p446_p11 }
  0x22   :  { %456 = shalt.err (!%p453_p1)
}
  0x23   :  { %22 = dma.hbm_to_vmem [thread:$0]  %s605_s0, 64, %s20_s8, [#allocation3]  }
  0x24   :  { %s457_s22 = scalar_lea.hbm %s608_s3, 1024 }
  0x25   :  { %p458_p2 = scmp.ne.s32.totalorder %s608_s3, %s457_s22  ;;  %p461_p3 = scmp.lt.u32.totalorder %s457_s22, %s608_s3 }
  0x27   :  { %p463_p4 = pnand %p461_p3, %p458_p2 }
  0x29   :  { %466 = shalt.err (!%p463_p4)
}
  0x2a   :  { %s467_s27 = scalar_lea.vmem %s43_s10, 1024  ;;  %p472_p6 = scmp.lt.s32.totalorder %s43_s10, %s43_s10 }
  0x2b   :  { %p468_p5 = scmp.ne.s32.totalorder %s43_s10, %s467_s27  ;;  %p473_p7 = scmp.lt.s32.totalorder %s467_s27, %s467_s27 }
  0x2d   :  { %p474_p8 = por %p473_p7, %p472_p6 }
  0x2f   :  { %p475_p9 = pnand %p474_p8, %p468_p5 }
  0x31   :  { %478 = shalt.err (!%p475_p9)
}
  0x32   :  { %48 = dma.hbm_to_vmem [thread:$0]  %s608_s3, 1024, %s43_s10, [#allocation6], %s508_s28, %s508_s28, %s509_s29  }
  0x33   :  { %501 = dma.done.wait [#allocation3], 64  }
  0x34   :  { %502 = vsyncadd [#allocation3], 4294967232 }
  0x35   :  { %503 = dma.done.wait [#allocation6], 2048  }
  0x36   :  { %504 = vsyncadd [#allocation6], 4294965248  ;;  %v512_v0 = vmov 0.0   ;;  %vm513_vm0 = vmmov 0   ;;  %v393_v1 = vld [vmem:[#allocation5] sm:$0xff]   ;;  %v394_v2 = vld [vmem:[#allocation5 + $0x8] sm:$0xff]  }
  0x37   :  { %345 = vmatprep.subr.bf16.mxu0 %v512_v0  ;;  %361 = vmatprep.mubr.msk.bf16.mxu0 %vm513_vm0, %v512_v0  ;;  %v395_v3 = vld [vmem:[#allocation5 + $0x10] sm:$0xff]   ;;  %v401_v4 = vld [vmem:[#allocation7] sm:$0xff]   ;;  %v396_v5 = vld [vmem:[#allocation5 + $0x18] sm:$0xff]  }
  0x38   :  { %365 = vmatprep.subr.bf16.mxu1 %v512_v0  ;;  %381 = vmatprep.mubr.msk.bf16.mxu1 %vm513_vm0, %v512_v0  ;;  %v402_v6 = vld [vmem:[#allocation7 + $0x8] sm:$0xff]   ;;  %v397_v7 = vld [vmem:[#allocation5 + $0x20] sm:$0xff]   ;;  %v403_v8 = vld [vmem:[#allocation7 + $0x10] sm:$0xff]  }
  0x39   :  { %346 = vmatpush3.bf16.msra.mxu0 %v393_v1  ;;  %366 = vmatpush3.bf16.msra.mxu1 %v401_v4  ;;  %v398_v9 = vld [vmem:[#allocation5 + $0x28] sm:$0xff]   ;;  %v404_v10 = vld [vmem:[#allocation7 + $0x18] sm:$0xff]   ;;  %v399_v11 = vld [vmem:[#allocation5 + $0x30] sm:$0xff]  }
  0x3a   :  { %347 = vmatprep.subr.bf16.mxu0 %v512_v0  ;;  %367 = vmatprep.subr.bf16.mxu1 %v512_v0  ;;  %v405_v12 = vld [vmem:[#allocation7 + $0x20] sm:$0xff]   ;;  %v400_v13 = vld [vmem:[#allocation5 + $0x38] sm:$0xff]   ;;  %v406_v14 = vld [vmem:[#allocation7 + $0x28] sm:$0xff]  }
  0x3b   :  { %v61_v15 = vld [vmem:[#allocation2] sm:$0xf]  ;;  %v407_v16 = vld [vmem:[#allocation7 + $0x30] sm:$0xff]  }
  0x3c   :  { %v408_v17 = vld [vmem:[#allocation7 + $0x38] sm:$0xff]  }
  0x3d   :  { %348 = vmatpush3.bf16.msra.mxu0 %v394_v2  ;;  %368 = vmatpush3.bf16.msra.mxu1 %v402_v6  ;;  %v308_v18 = vld [vmem:[%s607_s2] ss:$0 sm:$0xff]  ;;  %s514_s2 = smov [#allocation8]  }
  0x3e   :  { %349 = vmatprep.subr.bf16.mxu0 %v512_v0  ;;  %369 = vmatprep.subr.bf16.mxu1 %v512_v0  ;;  %v317_v25 = vld [vmem:[%s609_s4] ss:$0 sm:$0xff]  ;;  %s298_s7 = sshll.u32 %s514_s2, 4  ;;  %s299_s7 = int_to_ptr.vmem [resolvable:$true] %s298_s7 }
  0x3f   :  { %s479_s8 = scalar_lea.vmem %s299_s7, 128  ;;  %p484_p11 = scmp.lt.s32.totalorder %s299_s7, %s299_s7 }
  0x40   :  { %p480_p10 = scmp.ne.s32.totalorder %s299_s7, %s479_s8  ;;  %p485_p12 = scmp.lt.s32.totalorder %s479_s8, %s479_s8 }
  0x41   :  { %350 = vmatpush3.bf16.msra.mxu0 %v395_v3  ;;  %370 = vmatpush3.bf16.msra.mxu1 %v403_v8 }
  0x42   :  { %351 = vmatprep.subr.bf16.mxu0 %v512_v0  ;;  %371 = vmatprep.subr.bf16.mxu1 %v512_v0  ;;  %p486_p13 = por %p485_p12, %p484_p11 }
  0x44   :  { %p487_p0 = pnand %p486_p13, %p480_p10 }
  0x45   :  { %352 = vmatpush3.bf16.msra.mxu0 %v396_v5  ;;  %372 = vmatpush3.bf16.msra.mxu1 %v404_v10 }
  0x46   :  { %353 = vmatprep.subr.bf16.mxu0 %v512_v0  ;;  %373 = vmatprep.subr.bf16.mxu1 %v512_v0 }
  0x49   :  { %354 = vmatpush3.bf16.msra.mxu0 %v397_v7  ;;  %374 = vmatpush3.bf16.msra.mxu1 %v405_v12 }
  0x4a   :  { %355 = vmatprep.subr.bf16.mxu0 %v512_v0  ;;  %375 = vmatprep.subr.bf16.mxu1 %v512_v0 }
  0x4d   :  { %356 = vmatpush3.bf16.msra.mxu0 %v398_v9  ;;  %376 = vmatpush3.bf16.msra.mxu1 %v406_v14 }
  0x4e   :  { %357 = vmatprep.subr.bf16.mxu0 %v512_v0  ;;  %377 = vmatprep.subr.bf16.mxu1 %v512_v0 }
  0x51   :  { %358 = vmatpush3.bf16.msra.mxu0 %v399_v11  ;;  %378 = vmatpush3.bf16.msra.mxu1 %v407_v16 }
  0x52   :  { %359 = vmatprep.subr.bf16.mxu0 %v512_v0  ;;  %379 = vmatprep.subr.bf16.mxu1 %v512_v0 }
  0x55   :  { %360 = vmatpush3.bf16.msra.mxu0 %v400_v13  ;;  %380 = vmatpush3.bf16.msra.mxu1 %v408_v17 }
  0x58   :  { %362 = vmatmul.mubr.bf16.vlgmr.msra.gmra.mrb[0].mxu0 %v61_v15 }
 0x12b   :  { %v167_v19 = vpop.f32.mrb[0].mxu0 }
 0x12c   :  { %v168_v20 = vadd.f32 %v308_v18, %v167_v19  ;;  %v363_v21 = vpop.f32.mrb[1].mxu0 }
 0x12d   :  { %v170_v22 = vpop.f32.mrb[2].mxu0 }
 0x12e   :  { %v173_v23 = vpack.c.bf16 %v168_v20, %v168_v20  ;;  %v364_v24 = vpop.f32.mrb[3].mxu0 }
 0x130   :  { %382 = vmatmul.mubr.bf16.vlgmr.msra.gmra.mrb[0].mxu1 %v173_v23 }
 0x203   :  { %v279_v26 = vpop.f32.mrb[0].mxu1 }
 0x204   :  { %v280_v27 = vadd.f32 %v317_v25, %v279_v26  ;;  %v383_v28 = vpop.f32.mrb[1].mxu1 }
 0x205   :  { %v282_v29 = vpop.f32.mrb[2].mxu1 }
 0x206   :  { %v326_v30 = vmul.f32 -1.442695, %v280_v27  ;;  %v384_v31 = vpop.f32.mrb[3].mxu1 }
 0x208   :  { %409 = vpow2.f32 %v326_v30 }
 0x212   :  { %v410_v32 = vpop.eup %409 }
 0x213   :  { %v288_v33 = vadd.f32 1.0, %v410_v32 }
 0x215   :  { %411 = vrcp.f32 %v288_v33 }
 0x21f   :  { %v412_v34 = vpop.eup %411 }
 0x220   :  { %291 = vst [vmem:[#allocation8] sm:$0xff] %v412_v34 }
 0x221   :  { %490 = shalt.err (!%p487_p0)
}
 0x222   :  { %s491_s10 = scalar_lea.hbm %s610_s5, 128 }
 0x223   :  { %p492_p1 = scmp.ne.s32.totalorder %s610_s5, %s491_s10  ;;  %p495_p2 = scmp.lt.u32.totalorder %s491_s10, %s610_s5 }
 0x225   :  { %p497_p3 = pnand %p495_p2, %p492_p1 }
 0x227   :  { %500 = shalt.err (!%p497_p3)
}
 0x228   :  { %301 = dma.vmem_to_hbm [thread:$0]  %s299_s7, 128, %s610_s5, [#allocation4]  }
 0x229   :  { %505 = dma.done.wait [#allocation4], 128  }
 0x22a   :  { %506 = vsyncadd [#allocation4], 4294967168 }
 0x22b   :  { %305 = vsyncpa [#allocation3], 1 }
 0x22c   :  { %306 = vsyncpa [#allocation6], 1 }
 0x22d   :  { %307 = vsyncpa [#allocation4], 1 }

</bundles_post_ra>
